<compile_context>
chip_gen: v5e
topology: v5e:2x2
jax: 0.10.0
libtpu: 0.0.40
codegen_flags: <defaults>
</compile_context>

<pallas_src>
import jax
import jax.numpy as jnp
from jax import lax
from jax.experimental import pallas as pl
from jax.experimental.pallas import tpu as pltpu

K = 5                                   # kernel_size of Conv1dAuto
PAD = K // 2                            # "same" padding = floor(K/2) = 2
MAX_TILE_L = 4096                       # upper bound on the length tile (lanes)
MAX_NB = 8                              # max batch samples packed per grid step
VMEM_WORKSET_BUDGET = 14 * 1024 * 1024  # target per-step working set (bytes)
VMEM_LIMIT_BYTES = 48 * 1024 * 1024     # scoped-VMEM cap: safe on v5e/v6e/v7x


def _make_kernel(nb, tile_l, pad_rows, n_l_tiles, tail_valid):
    """Builds the fused conv+bn+relu kernel, specialized on static tiling."""
    need_tail_mask = (n_l_tiles > 1) and (tail_valid != tile_l)

    def kernel(x_ref, lh_ref, rh_ref, w_ref, b_ref, o_ref):
        # x_ref:  (nb, C_in, tile_l)  f32   center tile(s), auto-pipelined
        # lh_ref: (nb, C_in, PAD)     f32   left-halo columns
        # rh_ref: (nb, C_in, PAD)     f32   right-halo columns
        # w_ref:  (C_out, KCp)        bf16  BN-folded weights, im2col layout
        # b_ref:  (C_out, 1)          f32   folded bias
        # o_ref:  (nb, C_out, tile_l)
        t = pl.program_id(1)
        cols = []
        for s in range(nb):  # static unroll; nb is small (<= MAX_NB)
            xs = x_ref[s]
            if need_tail_mask:
                # The last length tile reads past L (partial block): zero those
                # columns so the "same"-padding semantics at the sequence end
                # stay exact for the final PAD valid outputs.
                col = lax.broadcasted_iota(jnp.int32, xs.shape, 1)
                is_last = t == (n_l_tiles - 1)
                xs = jnp.where(is_last & (col >= tail_valid), 0.0, xs)
            xw = jnp.concatenate(
                [lh_ref[s].astype(jnp.bfloat16),
                 xs.astype(jnp.bfloat16),
                 rh_ref[s].astype(jnp.bfloat16)],
                axis=1)                                  # (C_in, tile_l + 2*PAD)
            # im2col: row (k*C_in + c) of the column matrix holds x[c, l+k-PAD],
            # so the K taps accumulate inside one MXU contraction.
            cols.append(
                jnp.concatenate([xw[:, k:k + tile_l] for k in range(K)], axis=0))
        xcol = cols[0] if nb == 1 else jnp.concatenate(cols, axis=1)
        if pad_rows:
            # Zero-pad the contraction dim to a multiple of 16 (bf16 packing).
            xcol = jnp.concatenate(
                [xcol, jnp.zeros((pad_rows, nb * tile_l), jnp.bfloat16)], axis=0)
        acc = jnp.dot(w_ref[...], xcol,
                      preferred_element_type=jnp.float32)  # (C_out, nb*tile_l)
        y = jnp.maximum(acc + b_ref[...], 0.0)
        for s in range(nb):
            o_ref[s] = y[:, s * tile_l:(s + 1) * tile_l].astype(o_ref.dtype)

    return kernel


def _choose_tiling(N, C_in, C_out, L, max_tile_l=None):
    """Pick (batch-pack, length-tile, num length tiles) from a VMEM budget.

    Approx per-(sample*column) working-set bytes: double-buffered f32 in/out
    blocks + bf16 window + bf16 im2col + f32 accumulator
      = 8*C_in + 8*C_out + 2*C_in + 2*K*C_in + 4*C_out = 20*C_in + 12*C_out.
    """
    per_col = 20 * C_in + 12 * C_out
    cap = max(1, VMEM_WORKSET_BUDGET // per_col)
    if max_tile_l is not None:
        cap = min(cap, max_tile_l)
    if L <= cap:
        # Single length tile covers all of L; pack batch samples to fatten the
        # MXU RHS and amortize per-step pipeline overhead.
        tile_l, n_l_tiles = L, 1
        nb = max(1, min(N, MAX_NB, cap // max(L, 1)))
        if N >= 2:
            nb = min(nb, N // 2)   # keep >=2 grid steps so both v7x TCs get work
        nb = max(nb, 1)
        while N % nb:              # keep leading blocks exact (no edge masking)
            nb -= 1
    else:
        # Large L: tile the length dim with lane-dense 128-multiple tiles.
        tile_l = max(128, min(MAX_TILE_L, (cap // 128) * 128))
        nb, n_l_tiles = 1, pl.cdiv(L, tile_l)
    return nb, tile_l, n_l_tiles


def _build_halos(x, tile_l, n_l_tiles):
    """Tiny (n_tiles, N, C_in, PAD) left/right halo arrays (zeros at edges)."""
    N, C_in, L = x.shape
    zeros = jnp.zeros((N, C_in, PAD), x.dtype)
    lh, rh = [], []
    for t in range(n_l_tiles):
        t0 = t * tile_l
        lh.append(zeros if t == 0 else lax.slice_in_dim(x, t0 - PAD, t0, axis=2))
        avail = max(0, min(PAD, L - (t0 + tile_l)))
        if avail == 0:
            rh.append(zeros)
        else:
            r = lax.slice_in_dim(x, t0 + tile_l, t0 + tile_l + avail, axis=2)
            if avail < PAD:
                r = jnp.concatenate(
                    [r, jnp.zeros((N, C_in, PAD - avail), x.dtype)], axis=2)
            rh.append(r)
    return jnp.stack(lh, axis=0), jnp.stack(rh, axis=0)


def conv1d_block_pallas(x, w, b_conv, gamma, beta, run_mean, run_var,
                        eps=1e-5, out_dtype=jnp.float32, max_tile_l=None):
    """Fused Conv1d(k=5, same-pad) + BatchNorm1d(eval) + ReLU.

    x: (N, C_in, L) f32 -> (N, C_out, L) out_dtype (f32 default; pass bf16 to
    halve output store bytes if the consumer accepts it).
    """
    N, C_in, L = x.shape
    C_out = w.shape[0]
    assert w.shape == (C_out, C_in, K)

    # ---- Fold BatchNorm1d (eval) + conv bias into weights / one bias. -------
    scale = gamma * lax.rsqrt(run_var + eps)                 # (C_out,)
    bias = (b_conv - run_mean) * scale + beta                # (C_out,)
    w_folded = w * scale[:, None, None]                      # (C_out, C_in, K)
    # (C_out, K*C_in); column index k*C_in + c matches the kernel's im2col.
    w2d = jnp.transpose(w_folded, (0, 2, 1)).reshape(C_out, K * C_in)
    kc = K * C_in
    kcp = ((kc + 15) // 16) * 16                             # bf16 sublane pack
    pad_rows = kcp - kc
    if pad_rows:
        w2d = jnp.pad(w2d, ((0, 0), (0, pad_rows)))
    w2d = w2d.astype(jnp.bfloat16)
    bias2d = bias.reshape(C_out, 1).astype(jnp.float32)

    # ---- Tiling from VMEM budget; halo side-arrays (no extra pass over x). --
    nb, tile_l, n_l_tiles = _choose_tiling(N, C_in, C_out, L, max_tile_l)
    tail_valid = L - (n_l_tiles - 1) * tile_l
    lhalo, rhalo = _build_halos(x, tile_l, n_l_tiles)

    kernel = _make_kernel(nb, tile_l, pad_rows, n_l_tiles, tail_valid)
    grid = (N // nb, n_l_tiles)

    # TODO(synk): if a bundle dump shows the im2col concatenate saturating the
    # vst/XLU slots, move it into a persistent VMEM scratch / pltpu.roll form.
    out = pl.pallas_call(
        kernel,
        out_shape=jax.ShapeDtypeStruct((N, C_out, L), out_dtype),
        grid_spec=pltpu.PrefetchScalarGridSpec(
            num_scalar_prefetch=0,
            grid=grid,
            in_specs=[
                pl.BlockSpec((nb, C_in, tile_l), lambda n, t: (n, 0, t)),
                pl.BlockSpec((pl.Squeezed(), nb, C_in, PAD),
                             lambda n, t: (t, n, 0, 0)),
                pl.BlockSpec((pl.Squeezed(), nb, C_in, PAD),
                             lambda n, t: (t, n, 0, 0)),
                pl.BlockSpec((C_out, kcp), lambda n, t: (0, 0)),
                pl.BlockSpec((C_out, 1), lambda n, t: (0, 0)),
            ],
            out_specs=pl.BlockSpec((nb, C_out, tile_l), lambda n, t: (n, 0, t)),
        ),
        compiler_params=pltpu.CompilerParams(
            dimension_semantics=("parallel", "parallel"),
            vmem_limit_bytes=VMEM_LIMIT_BYTES),
    )(x, lhalo, rhalo, w2d, bias2d)
    return out


def reference(x, w, b_conv, gamma, beta, run_mean, run_var, eps=1e-5):
    y = lax.conv_general_dilated(
        x, w, window_strides=(1,), padding=[(PAD, PAD)],
        dimension_numbers=("NCH", "OIH", "NCH"))
    y = y + b_conv[None, :, None]
    y = (y - run_mean[None, :, None]) / jnp.sqrt(run_var[None, :, None] + eps)
    y = y * gamma[None, :, None] + beta[None, :, None]
    return jnp.maximum(y, 0.0)


if __name__ == "__main__":
    def run_case(N, C_in, C_out, L, key, max_tile_l=None):
        kx, kw, kb, kg, kbe, km, kv = jax.random.split(key, 7)
        x = jax.random.normal(kx, (N, C_in, L), dtype=jnp.float32)
        w = jax.random.normal(kw, (C_out, C_in, K), dtype=jnp.float32) * 0.1
        b_conv = jax.random.normal(kb, (C_out,), dtype=jnp.float32) * 0.1
        gamma = 1.0 + 0.1 * jax.random.normal(kg, (C_out,), dtype=jnp.float32)
        beta = 0.1 * jax.random.normal(kbe, (C_out,), dtype=jnp.float32)
        run_mean = 0.1 * jax.random.normal(km, (C_out,), dtype=jnp.float32)
        run_var = 1.0 + 0.1 * jax.random.uniform(kv, (C_out,), dtype=jnp.float32)

        out = conv1d_block_pallas(x, w, b_conv, gamma, beta, run_mean, run_var,
                                  max_tile_l=max_tile_l)
        out = jax.block_until_ready(out)
        ref = reference(x, w, b_conv, gamma, beta, run_mean, run_var)
        assert out.shape == ref.shape
        # bf16 operands / f32 accumulation: tolerance loosened vs f32 reference.
        assert jnp.allclose(out, ref, atol=2e-2, rtol=2e-2), (
            f"mismatch vs reference (N={N}, C_in={C_in}, C_out={C_out}, L={L})")

    key = jax.random.PRNGKey(0)
    k1, k2, k3 = jax.random.split(key, 3)
    # 1) Small single-tile case (shapes consistent with the module).
    run_case(2, 4, 6, 16, k1)
    # 2) Batch-packed single-tile case (several samples share one MXU matmul).
    run_case(8, 4, 6, 16, k2)
    # 3) Multi-tile case: halos across tiles + non-128-multiple tail (L % tile != 0).
    run_case(2, 4, 6, 300, k3, max_tile_l=128)

    print("KERNEL_OK")
</pallas_src>

<mosaic_0001>
module attributes {stable_mosaic.version = 11 : i64} {
  func.func @kernel(%arg0: i32, %arg1: i32, %arg2: memref<1x4x16xf32, #tpu.memory_space<vmem>>, %arg3: memref<1x1x4x2xf32, #tpu.memory_space<vmem>>, %arg4: memref<1x1x4x2xf32, #tpu.memory_space<vmem>>, %arg5: memref<6x32xbf16, #tpu.memory_space<vmem>>, %arg6: memref<6x1xf32, #tpu.memory_space<vmem>>, %arg7: memref<1x6x16xf32, #tpu.memory_space<vmem>>) attributes {dimension_semantics = [#tpu.dimension_semantics<parallel>, #tpu.dimension_semantics<parallel>], iteration_bounds = array<i64: 2, 1>, scalar_prefetch = 0 : i64, scratch_operands = 0 : i64, tpu.core_type = #tpu.core_type<tc>, window_params = [{transform_indices = @transform_0, window_bounds = array<i64: 1, 4, 16>}, {transform_indices = @transform_1, window_bounds = array<i64: 1, 1, 4, 2>}, {transform_indices = @transform_2, window_bounds = array<i64: 1, 1, 4, 2>}, {pipeline_mode = #tpu.pipeline_mode<synchronous>, transform_indices = @transform_3, window_bounds = array<i64: 6, 32>}, {pipeline_mode = #tpu.pipeline_mode<synchronous>, transform_indices = @transform_4, window_bounds = array<i64: 6, 1>}, {transform_indices = @transform_5, window_bounds = array<i64: 1, 6, 16>}]} {
    %c0 = arith.constant 0 : index
    %c0_0 = arith.constant 0 : index
    %c0_1 = arith.constant 0 : index
    %0 = vector.load %arg2[%c0, %c0_0, %c0_1] : memref<1x4x16xf32, #tpu.memory_space<vmem>>, vector<1x4x16xf32>
    %1 = vector.shape_cast %0 : vector<1x4x16xf32> to vector<4x16xf32>
    %c0_2 = arith.constant 0 : index
    %c0_3 = arith.constant 0 : index
    %c0_4 = arith.constant 0 : index
    %c0_5 = arith.constant 0 : index
    %2 = vector.load %arg3[%c0_2, %c0_3, %c0_4, %c0_5] : memref<1x1x4x2xf32, #tpu.memory_space<vmem>>, vector<1x1x4x2xf32>
    %3 = vector.shape_cast %2 : vector<1x1x4x2xf32> to vector<4x2xf32>
    %4 = arith.truncf %3 : vector<4x2xf32> to vector<4x2xbf16>
    %5 = arith.truncf %1 : vector<4x16xf32> to vector<4x16xbf16>
    %c0_6 = arith.constant 0 : index
    %c0_7 = arith.constant 0 : index
    %c0_8 = arith.constant 0 : index
    %c0_9 = arith.constant 0 : index
    %6 = vector.load %arg4[%c0_6, %c0_7, %c0_8, %c0_9] : memref<1x1x4x2xf32, #tpu.memory_space<vmem>>, vector<1x1x4x2xf32>
    %7 = vector.shape_cast %6 : vector<1x1x4x2xf32> to vector<4x2xf32>
    %8 = arith.truncf %7 : vector<4x2xf32> to vector<4x2xbf16>
    %9 = tpu.concatenate %4, %5, %8 in 1 : vector<4x2xbf16>, vector<4x16xbf16>, vector<4x2xbf16> -> vector<4x20xbf16>
    %10 = vector.extract_strided_slice %9 {offsets = [0, 0], sizes = [4, 16], strides = [1, 1]} : vector<4x20xbf16> to vector<4x16xbf16>
    %11 = vector.extract_strided_slice %9 {offsets = [0, 1], sizes = [4, 16], strides = [1, 1]} : vector<4x20xbf16> to vector<4x16xbf16>
    %12 = vector.extract_strided_slice %9 {offsets = [0, 2], sizes = [4, 16], strides = [1, 1]} : vector<4x20xbf16> to vector<4x16xbf16>
    %13 = vector.extract_strided_slice %9 {offsets = [0, 3], sizes = [4, 16], strides = [1, 1]} : vector<4x20xbf16> to vector<4x16xbf16>
    %14 = vector.extract_strided_slice %9 {offsets = [0, 4], sizes = [4, 16], strides = [1, 1]} : vector<4x20xbf16> to vector<4x16xbf16>
    %15 = tpu.concatenate %10, %11, %12, %13, %14 in 0 : vector<4x16xbf16>, vector<4x16xbf16>, vector<4x16xbf16>, vector<4x16xbf16>, vector<4x16xbf16> -> vector<20x16xbf16>
    %cst = arith.constant 0.000000e+00 : bf16
    %16 = vector.broadcast %cst : bf16 to vector<12x16xbf16>
    %17 = tpu.concatenate %15, %16 in 0 : vector<20x16xbf16>, vector<12x16xbf16> -> vector<32x16xbf16>
    %c0_10 = arith.constant 0 : index
    %c0_11 = arith.constant 0 : index
    %18 = vector.load %arg5[%c0_10, %c0_11] : memref<6x32xbf16, #tpu.memory_space<vmem>>, vector<6x32xbf16>
    %cst_12 = arith.constant dense<0.000000e+00> : vector<6x16xf32>
    %19 = tpu.matmul %18, %17, %cst_12 {dimension_numbers = #tpu.dot_dimension_numbers<[1], [0], [0], [1], [0, 0, 1, 1], [], []>} : vector<6x32xbf16>, vector<32x16xbf16>, vector<6x16xf32> -> vector<6x16xf32>
    %c0_13 = arith.constant 0 : index
    %c0_14 = arith.constant 0 : index
    %20 = vector.load %arg6[%c0_13, %c0_14] : memref<6x1xf32, #tpu.memory_space<vmem>>, vector<6x1xf32>
    %21 = vector.broadcast %20 : vector<6x1xf32> to vector<6x16xf32>
    %22 = arith.addf %19, %21 : vector<6x16xf32>
    %cst_15 = arith.constant 0.000000e+00 : f32
    %23 = vector.broadcast %cst_15 : f32 to vector<6x16xf32>
    %24 = arith.maximumf %22, %23 : vector<6x16xf32>
    %c0_16 = arith.constant 0 : index
    %c0_17 = arith.constant 0 : index
    %c0_18 = arith.constant 0 : index
    %25 = vector.load %arg7[%c0_16, %c0_17, %c0_18] : memref<1x6x16xf32, #tpu.memory_space<vmem>>, vector<1x6x16xf32>
    %26 = vector.shape_cast %25 : vector<1x6x16xf32> to vector<6x16xf32>
    %27 = vector.shape_cast %24 : vector<6x16xf32> to vector<1x6x16xf32>
    tpu.vector_store %arg7[%c0_16, %c0_17, %c0_18], %27 {strides = array<i32>} : memref<1x6x16xf32, #tpu.memory_space<vmem>>, vector<1x6x16xf32>,
    return
  }
  func.func @transform_0(%arg0: i32, %arg1: i32) -> (i32, i32, i32) {
    %c0_i32 = arith.constant 0 : i32
    %c0_i32_0 = arith.constant 0 : i32
    return %arg0, %c0_i32, %arg1 : i32, i32, i32
  }
  func.func @transform_1(%arg0: i32, %arg1: i32) -> (i32, i32, i32, i32) {
    %c0_i32 = arith.constant 0 : i32
    %c0_i32_0 = arith.constant 0 : i32
    %c0_i32_1 = arith.constant 0 : i32
    return %arg1, %arg0, %c0_i32, %c0_i32_0 : i32, i32, i32, i32
  }
  func.func @transform_2(%arg0: i32, %arg1: i32) -> (i32, i32, i32, i32) {
    %c0_i32 = arith.constant 0 : i32
    %c0_i32_0 = arith.constant 0 : i32
    %c0_i32_1 = arith.constant 0 : i32
    return %arg1, %arg0, %c0_i32, %c0_i32_0 : i32, i32, i32, i32
  }
  func.func @transform_3(%arg0: i32, %arg1: i32) -> (i32, i32) {
    %c0_i32 = arith.constant 0 : i32
    %c0_i32_0 = arith.constant 0 : i32
    %c0_i32_1 = arith.constant 0 : i32
    return %c0_i32, %c0_i32_0 : i32, i32
  }
  func.func @transform_4(%arg0: i32, %arg1: i32) -> (i32, i32) {
    %c0_i32 = arith.constant 0 : i32
    %c0_i32_0 = arith.constant 0 : i32
    %c0_i32_1 = arith.constant 0 : i32
    return %c0_i32, %c0_i32_0 : i32, i32
  }
  func.func @transform_5(%arg0: i32, %arg1: i32) -> (i32, i32, i32) {
    %c0_i32 = arith.constant 0 : i32
    %c0_i32_0 = arith.constant 0 : i32
    return %arg0, %c0_i32, %arg1 : i32, i32, i32
  }
}

</mosaic_0001>

<bundles_post_ra>
// kernel: tpu_custom_call.1
= control target key start
LH: loop header
LB: loop body
LE: loop exit
PB: predicated region body
PF: predicated region fallthrough
CT: control target
= control target key end

     0   :  { %s605_s18 = smov 0   ;;  %s607_s19 = smov 0   ;;  %s654_s0 = inlined_call_operand.vmem [shape: f32[2,4,16], index: 0, kind: input, shape index: {}]   ;;  %s655_s1 = inlined_call_operand.vmem [shape: f32[1,2,4,2], index: 1, kind: input, shape index: {}]   ;;  %s656_s2 = inlined_call_operand.vmem [shape: f32[1,2,4,2], index: 2, kind: input, shape index: {}]   ;;  %s657_s3 = inlined_call_operand.vmem [shape: bf16[6,32], index: 3, kind: input, shape index: {}]   ;;  %s658_s4 = inlined_call_operand.vmem [shape: f32[6,1], index: 4, kind: input, shape index: {}]   ;;  %s659_s5 = inlined_call_operand.vmem [shape: f32[2,6,16], index: 5, kind: output, shape index: {}]  }
   0x1   :  { %s609_s20 = smov 0  }
   0x2 LB: > { %s27_s21 = sadd.s32 1, %s562_s19  ;;  %p504_p0 = scmp.ge.s32.totalorder %s566_s20, 1  ;;  %s566_s20 = sphi %s609_s20, %s15_s20   ;;  %s562_s19 = sphi %s607_s19, %s661_s19   ;;  %s558_s18 = sphi %s605_s18, %s660_s18  }
   0x3   : > { %p29_p1 = scmp.ge.s32.totalorder %s27_s21, 2  ;;  %p235_p2 = scmp.lt.s32.totalorder %s566_s20, 3 }
   0x5   : > { %s663_s21 = smov (%p29_p1, %s27_s21), 0  ;;  %p236_p3 = pnand %p504_p0, %p235_p2 }
   0x6   : > { %p283_p4 = scmp.lt.s32.totalorder (!%p236_p3), %s558_s18, 1  ;;  %s568_s29 = smov (!%p236_p3), 2  }
   0x7   : > { %239 = sbr.rel (%p236_p3) target bundleno = 409 (0x199), region = 40  ;;  %s569_s30 = smov (!%p236_p3), 18  }
   0x8   : > { %s570_s9 = smov (!%p236_p3), 124   ;;  %s571_s10 = smov (!%p236_p3), 126  }
   0x9   : > { %s572_s11 = smov (!%p236_p3), 127   ;;  %s573_s12 = smov (!%p236_p3), 125  }
   0xc   : > { %s665_s18 = smov (!%p283_p4, %s558_s18), 1  ;;  %vm330_vm0 = vcmask 15360   ;;  %vm334_vm1 = vcmask 146432   ;;  %v364_v17 = vld [vmem:[%s658_s4] sm:$0x3f]  ;;  %v574_v18 = vmov 0  }
   0xd   : > { %s505_s22 = sshll.u32 %s665_s18, 2  ;;  %543 = vset.pattern.permute.xlu0 %v574_v18  ;;  %vm349_vm2 = vcmask 1041408   ;;  %vm352_vm3 = vcmask 1043456   ;;  %vm355_vm4 = vcmask 1045504   ;;  %v363_v27 = vld [vmem:[%s657_s3] sm:$0x7] }
   0xe   : > { %s289_s25 = scalar_lea.vmem %s654_s0, %s505_s22  ;;  %s305_s28 = scalar_lea.vmem %s656_s2, %s505_s22  ;;  %vm370_vm5 = vcmask 261120   ;;  %vm388_vm6 = vcmask 128000  }
   0xf   : > { %v314_v0 = vld [vmem:[%s289_s25] sm:$0xf]  ;;  %s297_s8 = scalar_lea.vmem %s655_s1, %s505_s22  ;;  %s508_s17 = sshll.u32 %s665_s18, 3 }
  0x10   : > { %v318_v1 = vld [vmem:[%s305_s28] sm:$0xf]  ;;  %v317_v2 = vpack.c.bf16 %v314_v0, %v314_v0  ;;  %s312_s24 = scalar_lea.vmem %s659_s5, %s508_s17 }
  0x11   : > { %v319_v4 = vpack.c.bf16 %v318_v1, %v318_v1  ;;  %v315_v9 = vld [vmem:[%s297_s8] sm:$0xf] }
  0x12   : > { %v321_v3 = vunpack.c.l.b16 %v317_v2  ;;  %v316_v10 = vpack.c.bf16 %v315_v9, %v315_v9 }
  0x13   : > { %v326_v6 = vunpack.c.l.b16 %v319_v4 }
  0x14   : > { %v322_v5 = vpack.c.b16 %v321_v3, %v321_v3 }
  0x15   : > { %v327_v7 = vpack.c.b16 %v326_v6, %v326_v6 }
  0x16   : > { %323 = vrot.lane.b32.xlu0 %v322_v5, %s568_s29 }
  0x1e   : > { %328 = vrot.lane.b32.xlu0 %v327_v7, %s569_s30 }
  0x26   : > { %367 = vperm.xlu0 %543, %v364_v17  }
  0x88   : > { %v324_v8 = vpop.permute.xlu0 %323 }
  0x89   : > { %v333_v11 = vsel %vm330_vm0, %v316_v10, %v324_v8 }
  0x90   : > { %v329_v12 = vpop.permute.xlu0 %328 }
  0x91   : > { %v336_v13 = vsel %vm334_vm1, %v333_v11, %v329_v12 }
  0x92   : > { %347 = vrot.lane.b32.xlu1 %v336_v13, %s570_s9  ;;  %v341_v14 = vrot.slane %v336_v13, 4  ;;  %v338_v15 = vrot.slane %v336_v13, 6  ;;  %v344_v16 = vrot.slane %v336_v13, 2 }
  0x94   : > { %342 = vrot.lane.b32.xlu2 %v341_v14, %s571_s10 }
  0x98   : > { %v368_v28 = vpop.permute.xlu0 %367 }
  0x9a   : > { %339 = vrot.lane.b32.xlu1 %v338_v15, %s572_s11 }
  0x9c   : > { %345 = vrot.lane.b32.xlu2 %v344_v16, %s573_s12 }
  0xee   : > { %v343_v19 = vpop.permute.xlu2 %342 }
  0xf6   : > { %v346_v24 = vpop.permute.xlu2 %345 }
 0x104   : > { %v348_v20 = vpop.permute.xlu1 %347 }
 0x105   : > { %v361_v21 = vsel %vm349_vm2, %v348_v20, 0 }
 0x106   : > { %380 = vmatpush.bf16.msra.mxu0 %v361_v21 }
 0x10c   : > { %v340_v22 = vpop.permute.xlu1 %339 }
 0x10d   : > { %v351_v23 = vsel %vm349_vm2, %v336_v13, %v340_v22 }
 0x10e   : > { %v354_v25 = vsel %vm352_vm3, %v351_v23, %v343_v19 }
 0x10f   : > { %v357_v26 = vsel %vm355_vm4, %v354_v25, %v346_v24 }
 0x110   : > { %381 = vmatpush.bf16.msra.mxu0 %v357_v26 }
 0x113   : > { %509 = vmatmul.msk.bf16.vlgmr.msra.gmra.mxu0 %vm370_vm5, %v363_v27 }
 0x190   : > { %v383_v29 = vpop.f32.mrf.mxu0 }
 0x191   : > { %v384_v30 = vadd.f32 %v383_v29, %v368_v28 }
 0x193   : > { %v387_v31 = vmax.f32 %v384_v30, 0.0 }
 0x195   : > { %389 = vst.msk [vmem:[%s312_s24] sm:$0x3f] %vm388_vm6, %v387_v31 }
 0x198   : > { %v385_v32 = vpop.f32.mrf.mxu0 }
 0x199 PF: > { %s15_s20 = sadd.s32 1, %s566_s20   ;;  %s660_s18 = smov %s562_s19 }
 0x19a   : > { %p12_p5 = scmp.ge.s32.totalorder %s15_s20, 4   ;;  %s661_s19 = smov %s663_s21 }
 0x19c   :  { %14 = sbr.rel (!%p12_p5) target bundleno = 2 (0x2), region = 76 }

</bundles_post_ra>
